<compile_context>
chip_gen: v6e
topology: v6e:2x2x1
jax: 0.10.0
libtpu: 0.0.40
codegen_flags: <defaults>
</compile_context>

<pallas_src>
import math

import jax
import jax.numpy as jnp
from jax import lax
from jax.experimental import pallas as pl
from jax.experimental.pallas import tpu as pltpu


def _round_up(x, m):
    return ((x + m - 1) // m) * m


def _pad2(a, rows, cols):
    return jnp.pad(a, ((0, rows - a.shape[0]), (0, cols - a.shape[1])))


def _vmem_limit(bytes_needed):
    """Scoped-VMEM request: actual working set + headroom, capped below the
    physical per-core VMEM so Mosaic keeps room for its internal scratch."""
    try:
        cap = int(pltpu.get_tpu_info().vmem_capacity_bytes)
    except Exception:
        cap = 64 << 20                      # conservative: v7x per-TC physical VMEM
    cap = max(cap - (12 << 20), 16 << 20)   # 12 MiB headroom for Mosaic internals
    return int(min(max(bytes_needed + (4 << 20), 16 << 20), cap))


def transformer_layer(x, params, *, mxu_dtype=jnp.bfloat16, max_tile_s=256):
    # TODO(synk): for very long sequences (Sp >~ 4-8K) add a second "arbitrary"
    # KV grid axis with an online-softmax (flash) accumulator so VMEM use is
    # independent of Sp; and shard query tiles across v7x's two TensorCores via
    # core_map instead of the fused single-core K init.
    S, D = x.shape
    d_int = params["wq"].shape[0]

    Dp = _round_up(D, 128)                       # lane-pad d_model
    Ip = _round_up(d_int, 128)                   # lane-pad d_internal
    tile_s = _round_up(min(max_tile_s, _round_up(S, 16)), 16)   # bf16 sublane packing
    Sp = _round_up(S, tile_s)
    n_tiles = Sp // tile_s
    inv_sqrt_dk = 1.0 / math.sqrt(float(d_int))

    # ---- one-time layout plumbing (outside the kernel): pad + transpose + bf16 ----
    wq_t = _pad2(params["wq"], Ip, Dp).T.astype(mxu_dtype)   # (Dp, Ip)
    wk_t = _pad2(params["wk"], Ip, Dp).T.astype(mxu_dtype)   # (Dp, Ip)
    wo_t = _pad2(params["wo"], Dp, Ip).T.astype(mxu_dtype)   # (Ip, Dp)
    w1_t = _pad2(params["w1"], Ip, Dp).T.astype(mxu_dtype)   # (Dp, Ip)
    w2_t = _pad2(params["w2"], Dp, Ip).T.astype(mxu_dtype)   # (Ip, Dp)
    bq = _pad2(params["bq"], 1, Ip)
    bk = _pad2(params["bk"], 1, Ip)
    bo = _pad2(params["bo"], 1, Dp)
    b1 = _pad2(params["b1"], 1, Ip)
    b2 = _pad2(params["b2"], 1, Dp)
    x_p = _pad2(x.astype(jnp.float32), Sp, Dp)
    # additive key-padding mask: 0 for real keys, -1e30 for zero-padded rows
    mask = jnp.where(jnp.arange(Sp) < S, 0.0, -1e30).astype(jnp.float32).reshape(1, Sp)

    # ------------------ fused kernel: K proj + attention + FFN --------------------
    def layer_kernel(x_ref, mask_ref, wq_ref, bq_ref, wk_ref, bk_ref,
                     wo_ref, bo_ref, w1_ref, b1_ref, w2_ref, b2_ref,
                     out_ref, k_scr):
        i = pl.program_id(0)

        # K (= V) projection once, into persistent VMEM scratch.
        @pl.when(i == 0)
        def _():
            xb_all = x_ref[...].astype(mxu_dtype)                         # (Sp, Dp)
            k_full = jnp.dot(xb_all, wk_ref[...],
                             preferred_element_type=jnp.float32) + bk_ref[...]
            k_scr[...] = k_full.astype(k_scr.dtype)                       # (Sp, Ip)

        row0 = pl.multiple_of(i * tile_s, tile_s)
        x_f32 = x_ref[pl.ds(row0, tile_s), :]                             # (tile_s, Dp) f32
        xb = x_f32.astype(mxu_dtype)
        k = k_scr[...]                                                    # (Sp, Ip) bf16; v = k

        # q projection with 1/sqrt(d_k) folded in (bf16 operands, f32 accumulate)
        q = jnp.dot(xb, wq_ref[...], preferred_element_type=jnp.float32) + bq_ref[...]
        q = (q * inv_sqrt_dk).astype(mxu_dtype)

        # scores: contract feature dims directly (same pattern as flash-attn einsum;
        # lowers to a transposed-RHS MXU matmul, no per-step XLU transpose of K)
        scores = lax.dot_general(q, k, dimension_numbers=(((1,), (1,)), ((), ())),
                                 preferred_element_type=jnp.float32)      # (tile_s, Sp)
        scores = scores + mask_ref[...]                                   # additive pad mask

        # numerically stable softmax; exact reciprocal for closer f32 parity
        m = jnp.max(scores, axis=-1, keepdims=True)
        e = jnp.exp(scores - m)
        denom = jnp.sum(e, axis=-1, keepdims=True)
        attn = (e * pl.reciprocal(denom, approx=False)).astype(mxu_dtype)

        z = jnp.dot(attn, k, preferred_element_type=jnp.float32)          # (tile_s, Ip)
        attn_out = jnp.dot(z.astype(mxu_dtype), wo_ref[...],
                           preferred_element_type=jnp.float32) + bo_ref[...]
        residual = x_f32 + attn_out                                        # f32

        h = jnp.dot(residual.astype(mxu_dtype), w1_ref[...],
                    preferred_element_type=jnp.float32) + b1_ref[...]
        h = jnp.maximum(h, 0.0).astype(mxu_dtype)
        ff = jnp.dot(h, w2_ref[...], preferred_element_type=jnp.float32) + b2_ref[...]

        out_ref[...] = (ff + residual).astype(out_ref.dtype)

    # ---- honest VMEM accounting: default x2 pipeline buffers on every input ----
    in_bytes = (
        Sp * Dp * 4                      # resident x (f32)
        + 8 * Sp * 4                     # mask (sublane-padded)
        + 5 * Dp * Ip * 2                # resident bf16 weights (wq, wk, wo, w1, w2)
        + 8 * (3 * Ip + 2 * Dp) * 4      # f32 biases (sublane-padded)
    )
    out_bytes = tile_s * Dp * 4
    scratch_bytes = Sp * Ip * 2          # K scratch (single-buffered)
    temp_bytes = (
        2 * tile_s * Sp * 4              # scores + e (f32)
        + tile_s * Sp * 2                # attn (bf16)
        + 6 * tile_s * max(Dp, Ip) * 4   # q/z/residual/h/ff etc. (f32)
    )
    main_bytes = 2 * (in_bytes + out_bytes) + scratch_bytes + temp_bytes

    flops = 2 * (5 * Sp * Dp * Ip + 2 * Sp * Sp * Ip)
    transcendentals = Sp * Sp + Sp
    bytes_accessed = (
        Sp * Dp * 4                      # read x
        + 5 * Dp * Ip * 2                # read weights
        + (3 * Ip + 2 * Dp) * 4          # read biases
        + Sp * 4                         # read mask
        + Sp * Dp * 4                    # write output
    )

    out_p = pl.pallas_call(
        layer_kernel,
        out_shape=jax.ShapeDtypeStruct((Sp, Dp), jnp.float32),
        grid=(n_tiles,),
        in_specs=[
            pl.BlockSpec((Sp, Dp),  lambda i: (0, 0)),   # x, fully resident
            pl.BlockSpec((1, Sp),   lambda i: (0, 0)),   # key-pad mask bias
            pl.BlockSpec((Dp, Ip),  lambda i: (0, 0)),   # wq^T
            pl.BlockSpec((1, Ip),   lambda i: (0, 0)),   # bq
            pl.BlockSpec((Dp, Ip),  lambda i: (0, 0)),   # wk^T
            pl.BlockSpec((1, Ip),   lambda i: (0, 0)),   # bk
            pl.BlockSpec((Ip, Dp),  lambda i: (0, 0)),   # wo^T
            pl.BlockSpec((1, Dp),   lambda i: (0, 0)),   # bo
            pl.BlockSpec((Dp, Ip),  lambda i: (0, 0)),   # w1^T
            pl.BlockSpec((1, Ip),   lambda i: (0, 0)),   # b1
            pl.BlockSpec((Ip, Dp),  lambda i: (0, 0)),   # w2^T
            pl.BlockSpec((1, Dp),   lambda i: (0, 0)),   # b2
        ],
        out_specs=pl.BlockSpec((tile_s, Dp), lambda i: (i, 0)),
        scratch_shapes=[pltpu.VMEM((Sp, Ip), mxu_dtype)],
        compiler_params=pltpu.CompilerParams(
            # "arbitrary": K scratch is initialized at step 0 and reused by later
            # steps, so the grid must run sequentially on one core.
            dimension_semantics=("arbitrary",),
            vmem_limit_bytes=_vmem_limit(main_bytes)),
        cost_estimate=pl.CostEstimate(flops=int(flops),
                                      transcendentals=int(transcendentals),
                                      bytes_accessed=int(bytes_accessed)),
    )(x_p, mask, wq_t, bq, wk_t, bk, wo_t, bo, w1_t, b1, w2_t, b2)

    return out_p[:S, :D]


def init_params(key, d_model, d_internal):
    """Deterministic init mimicking torch.nn.Linear (uniform(-1/sqrt(in), 1/sqrt(in)))."""
    def linear(key, out_f, in_f):
        kw, kb = jax.random.split(key)
        bound = 1.0 / jnp.sqrt(jnp.float32(in_f))
        w = jax.random.uniform(kw, (out_f, in_f), jnp.float32, -bound, bound)
        b = jax.random.uniform(kb, (1, out_f), jnp.float32, -bound, bound)
        return w, b

    keys = jax.random.split(key, 7)
    wq, bq = linear(keys[0], d_internal, d_model)   # query_linear
    wk, bk = linear(keys[1], d_internal, d_model)   # key_linear
    wv, bv = linear(keys[2], d_internal, d_model)   # value_linear (unused in forward)
    wo, bo = linear(keys[3], d_model, d_internal)   # output_linear
    w1, b1 = linear(keys[4], d_internal, d_model)   # linear1
    w2, b2 = linear(keys[5], d_model, d_internal)   # linear2
    return dict(wq=wq, bq=bq, wk=wk, bk=bk, wv=wv, bv=bv,
                wo=wo, bo=bo, w1=w1, b1=b1, w2=w2, b2=b2)


def reference_forward(x, p):
    """Pure-JAX f32 reference replicating the PyTorch forward exactly."""
    q = x @ p["wq"].T + p["bq"]
    k = x @ p["wk"].T + p["bk"]
    v = k  # v = key_linear(x) as in reference
    dk = k.shape[-1]
    scores = (q @ k.T) / jnp.sqrt(jnp.float32(dk))
    attn = jax.nn.softmax(scores, axis=-1)
    z = attn @ v
    attn_out = z @ p["wo"].T + p["bo"]
    residual = x + attn_out
    h = jax.nn.relu(residual @ p["w1"].T + p["b1"])
    ff = h @ p["w2"].T + p["b2"]
    return ff + residual


if __name__ == "__main__":
    seq, d_model, d_internal = 8, 32, 16
    key = jax.random.PRNGKey(0)
    kx, kp = jax.random.split(key)
    x = jax.random.normal(kx, (seq, d_model), jnp.float32)
    params = init_params(kp, d_model, d_internal)

    out = transformer_layer(x, params)
    jax.block_until_ready(out)

    ref = reference_forward(x, params)
    assert out.shape == (seq, d_model)
    # tolerance loosened because MXU operands are bf16 (accumulation stays f32)
    assert jnp.allclose(out, ref, atol=1e-1, rtol=1e-1), "mismatch vs reference"

    print("KERNEL_OK")
</pallas_src>

<mosaic_0001>
module attributes {stable_mosaic.version = 11 : i64} {
  func.func @layer_kernel(%arg0: i32, %arg1: memref<16x128xf32, #tpu.memory_space<vmem>>, %arg2: memref<1x16xf32, #tpu.memory_space<vmem>>, %arg3: memref<128x128xbf16, #tpu.memory_space<vmem>>, %arg4: memref<1x128xf32, #tpu.memory_space<vmem>>, %arg5: memref<128x128xbf16, #tpu.memory_space<vmem>>, %arg6: memref<1x128xf32, #tpu.memory_space<vmem>>, %arg7: memref<128x128xbf16, #tpu.memory_space<vmem>>, %arg8: memref<1x128xf32, #tpu.memory_space<vmem>>, %arg9: memref<128x128xbf16, #tpu.memory_space<vmem>>, %arg10: memref<1x128xf32, #tpu.memory_space<vmem>>, %arg11: memref<128x128xbf16, #tpu.memory_space<vmem>>, %arg12: memref<1x128xf32, #tpu.memory_space<vmem>>, %arg13: memref<16x128xf32, #tpu.memory_space<vmem>>, %arg14: memref<16x128xbf16, #tpu.memory_space<vmem>>) attributes {dimension_semantics = [#tpu.dimension_semantics<arbitrary>], iteration_bounds = array<i64: 1>, scalar_prefetch = 0 : i64, scratch_operands = 1 : i64, tpu.core_type = #tpu.core_type<tc>, window_params = [{pipeline_mode = #tpu.pipeline_mode<synchronous>, transform_indices = @transform_0, window_bounds = array<i64: 16, 128>}, {pipeline_mode = #tpu.pipeline_mode<synchronous>, transform_indices = @transform_1, window_bounds = array<i64: 1, 16>}, {pipeline_mode = #tpu.pipeline_mode<synchronous>, transform_indices = @transform_2, window_bounds = array<i64: 128, 128>}, {pipeline_mode = #tpu.pipeline_mode<synchronous>, transform_indices = @transform_3, window_bounds = array<i64: 1, 128>}, {pipeline_mode = #tpu.pipeline_mode<synchronous>, transform_indices = @transform_4, window_bounds = array<i64: 128, 128>}, {pipeline_mode = #tpu.pipeline_mode<synchronous>, transform_indices = @transform_5, window_bounds = array<i64: 1, 128>}, {pipeline_mode = #tpu.pipeline_mode<synchronous>, transform_indices = @transform_6, window_bounds = array<i64: 128, 128>}, {pipeline_mode = #tpu.pipeline_mode<synchronous>, transform_indices = @transform_7, window_bounds = array<i64: 1, 128>}, {pipeline_mode = #tpu.pipeline_mode<synchronous>, transform_indices = @transform_8, window_bounds = array<i64: 128, 128>}, {pipeline_mode = #tpu.pipeline_mode<synchronous>, transform_indices = @transform_9, window_bounds = array<i64: 1, 128>}, {pipeline_mode = #tpu.pipeline_mode<synchronous>, transform_indices = @transform_10, window_bounds = array<i64: 128, 128>}, {pipeline_mode = #tpu.pipeline_mode<synchronous>, transform_indices = @transform_11, window_bounds = array<i64: 1, 128>}, {transform_indices = @transform_12, window_bounds = array<i64: 16, 128>}]} {
    %c0_i32 = arith.constant 0 : i32
    %0 = arith.cmpi eq, %arg0, %c0_i32 : i32
    %1 = arith.extui %0 : i1 to i32
    %c0_i32_0 = arith.constant 0 : i32
    %2 = arith.cmpi ne, %1, %c0_i32_0 : i32
    scf.if %2 {
      %c0_32 = arith.constant 0 : index
      %c0_33 = arith.constant 0 : index
      %56 = vector.load %arg1[%c0_32, %c0_33] : memref<16x128xf32, #tpu.memory_space<vmem>>, vector<16x128xf32>
      %57 = arith.truncf %56 : vector<16x128xf32> to vector<16x128xbf16>
      %c0_34 = arith.constant 0 : index
      %c0_35 = arith.constant 0 : index
      %58 = vector.load %arg5[%c0_34, %c0_35] : memref<128x128xbf16, #tpu.memory_space<vmem>>, vector<128x128xbf16>
      %cst_36 = arith.constant dense<0.000000e+00> : vector<16x128xf32>
      %59 = tpu.matmul %57, %58, %cst_36 {dimension_numbers = #tpu.dot_dimension_numbers<[1], [0], [0], [1], [0, 0, 1, 1], [], []>} : vector<16x128xbf16>, vector<128x128xbf16>, vector<16x128xf32> -> vector<16x128xf32>
      %c0_37 = arith.constant 0 : index
      %c0_38 = arith.constant 0 : index
      %60 = vector.load %arg6[%c0_37, %c0_38] : memref<1x128xf32, #tpu.memory_space<vmem>>, vector<1x128xf32>
      %61 = vector.broadcast %60 : vector<1x128xf32> to vector<16x128xf32>
      %62 = arith.addf %59, %61 : vector<16x128xf32>
      %63 = arith.truncf %62 : vector<16x128xf32> to vector<16x128xbf16>
      %c0_39 = arith.constant 0 : index
      %c0_40 = arith.constant 0 : index
      %64 = vector.load %arg14[%c0_39, %c0_40] : memref<16x128xbf16, #tpu.memory_space<vmem>>, vector<16x128xbf16>
      tpu.vector_store %arg14[%c0_39, %c0_40], %63 {strides = array<i32>} : memref<16x128xbf16, #tpu.memory_space<vmem>>, vector<16x128xbf16>,
    } else {
    }
    %c16_i32 = arith.constant 16 : i32
    %3 = arith.muli %arg0, %c16_i32 : i32
    %4 = tpu.assume_multiple %3, 16 : i32
    %5 = arith.index_cast %4 : i32 to index
    %c0 = arith.constant 0 : index
    %6 = vector.load %arg1[%5, %c0] : memref<16x128xf32, #tpu.memory_space<vmem>>, vector<16x128xf32>
    %7 = arith.truncf %6 : vector<16x128xf32> to vector<16x128xbf16>
    %c0_1 = arith.constant 0 : index
    %c0_2 = arith.constant 0 : index
    %8 = vector.load %arg14[%c0_1, %c0_2] : memref<16x128xbf16, #tpu.memory_space<vmem>>, vector<16x128xbf16>
    %c0_3 = arith.constant 0 : index
    %c0_4 = arith.constant 0 : index
    %9 = vector.load %arg3[%c0_3, %c0_4] : memref<128x128xbf16, #tpu.memory_space<vmem>>, vector<128x128xbf16>
    %cst = arith.constant dense<0.000000e+00> : vector<16x128xf32>
    %10 = tpu.matmul %7, %9, %cst {dimension_numbers = #tpu.dot_dimension_numbers<[1], [0], [0], [1], [0, 0, 1, 1], [], []>} : vector<16x128xbf16>, vector<128x128xbf16>, vector<16x128xf32> -> vector<16x128xf32>
    %c0_5 = arith.constant 0 : index
    %c0_6 = arith.constant 0 : index
    %11 = vector.load %arg4[%c0_5, %c0_6] : memref<1x128xf32, #tpu.memory_space<vmem>>, vector<1x128xf32>
    %12 = vector.broadcast %11 : vector<1x128xf32> to vector<16x128xf32>
    %13 = arith.addf %10, %12 : vector<16x128xf32>
    %cst_7 = arith.constant 2.500000e-01 : f32
    %14 = vector.broadcast %cst_7 : f32 to vector<16x128xf32>
    %15 = arith.mulf %13, %14 : vector<16x128xf32>
    %16 = arith.truncf %15 : vector<16x128xf32> to vector<16x128xbf16>
    %cst_8 = arith.constant dense<0.000000e+00> : vector<16x16xf32>
    %17 = tpu.matmul %16, %8, %cst_8 {dimension_numbers = #tpu.dot_dimension_numbers<[1], [1], [0], [0], [0, 0, 1, 0], [], []>} : vector<16x128xbf16>, vector<16x128xbf16>, vector<16x16xf32> -> vector<16x16xf32>
    %c0_9 = arith.constant 0 : index
    %c0_10 = arith.constant 0 : index
    %18 = vector.load %arg2[%c0_9, %c0_10] : memref<1x16xf32, #tpu.memory_space<vmem>>, vector<1x16xf32>
    %19 = vector.broadcast %18 : vector<1x16xf32> to vector<16x16xf32>
    %20 = arith.addf %17, %19 : vector<16x16xf32>
    %cst_11 = arith.constant dense<0xFF800000> : vector<16xf32>
    %21 = vector.multi_reduction <maximumf>, %20, %cst_11 [1] : vector<16x16xf32> to vector<16xf32>
    %22 = vector.shape_cast %21 : vector<16xf32> to vector<16x1xf32>
    %23 = vector.broadcast %22 : vector<16x1xf32> to vector<16x16xf32>
    %24 = arith.subf %20, %23 : vector<16x16xf32>
    %25 = math.exp %24 : vector<16x16xf32>
    %cst_12 = arith.constant dense<0.000000e+00> : vector<16xf32>
    %26 = vector.multi_reduction <add>, %25, %cst_12 [1] : vector<16x16xf32> to vector<16xf32>
    %27 = vector.shape_cast %26 : vector<16xf32> to vector<16x1xf32>
    %28 = tpu.reciprocal %27 : vector<16x1xf32> -> vector<16x1xf32>
    %29 = vector.broadcast %28 : vector<16x1xf32> to vector<16x16xf32>
    %30 = arith.mulf %25, %29 : vector<16x16xf32>
    %31 = arith.truncf %30 : vector<16x16xf32> to vector<16x16xbf16>
    %cst_13 = arith.constant dense<0.000000e+00> : vector<16x128xf32>
    %32 = tpu.matmul %31, %8, %cst_13 {dimension_numbers = #tpu.dot_dimension_numbers<[1], [0], [0], [1], [0, 0, 1, 1], [], []>} : vector<16x16xbf16>, vector<16x128xbf16>, vector<16x128xf32> -> vector<16x128xf32>
    %33 = arith.truncf %32 : vector<16x128xf32> to vector<16x128xbf16>
    %c0_14 = arith.constant 0 : index
    %c0_15 = arith.constant 0 : index
    %34 = vector.load %arg7[%c0_14, %c0_15] : memref<128x128xbf16, #tpu.memory_space<vmem>>, vector<128x128xbf16>
    %cst_16 = arith.constant dense<0.000000e+00> : vector<16x128xf32>
    %35 = tpu.matmul %33, %34, %cst_16 {dimension_numbers = #tpu.dot_dimension_numbers<[1], [0], [0], [1], [0, 0, 1, 1], [], []>} : vector<16x128xbf16>, vector<128x128xbf16>, vector<16x128xf32> -> vector<16x128xf32>
    %c0_17 = arith.constant 0 : index
    %c0_18 = arith.constant 0 : index
    %36 = vector.load %arg8[%c0_17, %c0_18] : memref<1x128xf32, #tpu.memory_space<vmem>>, vector<1x128xf32>
    %37 = vector.broadcast %36 : vector<1x128xf32> to vector<16x128xf32>
    %38 = arith.addf %35, %37 : vector<16x128xf32>
    %39 = arith.addf %6, %38 : vector<16x128xf32>
    %40 = arith.truncf %39 : vector<16x128xf32> to vector<16x128xbf16>
    %c0_19 = arith.constant 0 : index
    %c0_20 = arith.constant 0 : index
    %41 = vector.load %arg9[%c0_19, %c0_20] : memref<128x128xbf16, #tpu.memory_space<vmem>>, vector<128x128xbf16>
    %cst_21 = arith.constant dense<0.000000e+00> : vector<16x128xf32>
    %42 = tpu.matmul %40, %41, %cst_21 {dimension_numbers = #tpu.dot_dimension_numbers<[1], [0], [0], [1], [0, 0, 1, 1], [], []>} : vector<16x128xbf16>, vector<128x128xbf16>, vector<16x128xf32> -> vector<16x128xf32>
    %c0_22 = arith.constant 0 : index
    %c0_23 = arith.constant 0 : index
    %43 = vector.load %arg10[%c0_22, %c0_23] : memref<1x128xf32, #tpu.memory_space<vmem>>, vector<1x128xf32>
    %44 = vector.broadcast %43 : vector<1x128xf32> to vector<16x128xf32>
    %45 = arith.addf %42, %44 : vector<16x128xf32>
    %cst_24 = arith.constant 0.000000e+00 : f32
    %46 = vector.broadcast %cst_24 : f32 to vector<16x128xf32>
    %47 = arith.maximumf %45, %46 : vector<16x128xf32>
    %48 = arith.truncf %47 : vector<16x128xf32> to vector<16x128xbf16>
    %c0_25 = arith.constant 0 : index
    %c0_26 = arith.constant 0 : index
    %49 = vector.load %arg11[%c0_25, %c0_26] : memref<128x128xbf16, #tpu.memory_space<vmem>>, vector<128x128xbf16>
    %cst_27 = arith.constant dense<0.000000e+00> : vector<16x128xf32>
    %50 = tpu.matmul %48, %49, %cst_27 {dimension_numbers = #tpu.dot_dimension_numbers<[1], [0], [0], [1], [0, 0, 1, 1], [], []>} : vector<16x128xbf16>, vector<128x128xbf16>, vector<16x128xf32> -> vector<16x128xf32>
    %c0_28 = arith.constant 0 : index
    %c0_29 = arith.constant 0 : index
    %51 = vector.load %arg12[%c0_28, %c0_29] : memref<1x128xf32, #tpu.memory_space<vmem>>, vector<1x128xf32>
    %52 = vector.broadcast %51 : vector<1x128xf32> to vector<16x128xf32>
    %53 = arith.addf %50, %52 : vector<16x128xf32>
    %54 = arith.addf %53, %39 : vector<16x128xf32>
    %c0_30 = arith.constant 0 : index
    %c0_31 = arith.constant 0 : index
    %55 = vector.load %arg13[%c0_30, %c0_31] : memref<16x128xf32, #tpu.memory_space<vmem>>, vector<16x128xf32>
    tpu.vector_store %arg13[%c0_30, %c0_31], %54 {strides = array<i32>} : memref<16x128xf32, #tpu.memory_space<vmem>>, vector<16x128xf32>,
    return
  }
  func.func @transform_0(%arg0: i32) -> (i32, i32) {
    %c0_i32 = arith.constant 0 : i32
    %c0_i32_0 = arith.constant 0 : i32
    %c0_i32_1 = arith.constant 0 : i32
    return %c0_i32, %c0_i32_0 : i32, i32
  }
  func.func @transform_1(%arg0: i32) -> (i32, i32) {
    %c0_i32 = arith.constant 0 : i32
    %c0_i32_0 = arith.constant 0 : i32
    %c0_i32_1 = arith.constant 0 : i32
    return %c0_i32, %c0_i32_0 : i32, i32
  }
  func.func @transform_2(%arg0: i32) -> (i32, i32) {
    %c0_i32 = arith.constant 0 : i32
    %c0_i32_0 = arith.constant 0 : i32
    %c0_i32_1 = arith.constant 0 : i32
    return %c0_i32, %c0_i32_0 : i32, i32
  }
  func.func @transform_3(%arg0: i32) -> (i32, i32) {
    %c0_i32 = arith.constant 0 : i32
    %c0_i32_0 = arith.constant 0 : i32
    %c0_i32_1 = arith.constant 0 : i32
    return %c0_i32, %c0_i32_0 : i32, i32
  }
  func.func @transform_4(%arg0: i32) -> (i32, i32) {
    %c0_i32 = arith.constant 0 : i32
    %c0_i32_0 = arith.constant 0 : i32
    %c0_i32_1 = arith.constant 0 : i32
    return %c0_i32, %c0_i32_0 : i32, i32
  }
  func.func @transform_5(%arg0: i32) -> (i32, i32) {
    %c0_i32 = arith.constant 0 : i32
    %c0_i32_0 = arith.constant 0 : i32
    %c0_i32_1 = arith.constant 0 : i32
    return %c0_i32, %c0_i32_0 : i32, i32
  }
  func.func @transform_6(%arg0: i32) -> (i32, i32) {
    %c0_i32 = arith.constant 0 : i32
    %c0_i32_0 = arith.constant 0 : i32
    %c0_i32_1 = arith.constant 0 : i32
    return %c0_i32, %c0_i32_0 : i32, i32
  }
  func.func @transform_7(%arg0: i32) -> (i32, i32) {
    %c0_i32 = arith.constant 0 : i32
    %c0_i32_0 = arith.constant 0 : i32
    %c0_i32_1 = arith.constant 0 : i32
    return %c0_i32, %c0_i32_0 : i32, i32
  }
  func.func @transform_8(%arg0: i32) -> (i32, i32) {
    %c0_i32 = arith.constant 0 : i32
    %c0_i32_0 = arith.constant 0 : i32
    %c0_i32_1 = arith.constant 0 : i32
    return %c0_i32, %c0_i32_0 : i32, i32
  }
  func.func @transform_9(%arg0: i32) -> (i32, i32) {
    %c0_i32 = arith.constant 0 : i32
    %c0_i32_0 = arith.constant 0 : i32
    %c0_i32_1 = arith.constant 0 : i32
    return %c0_i32, %c0_i32_0 : i32, i32
  }
  func.func @transform_10(%arg0: i32) -> (i32, i32) {
    %c0_i32 = arith.constant 0 : i32
    %c0_i32_0 = arith.constant 0 : i32
    %c0_i32_1 = arith.constant 0 : i32
    return %c0_i32, %c0_i32_0 : i32, i32
  }
  func.func @transform_11(%arg0: i32) -> (i32, i32) {
    %c0_i32 = arith.constant 0 : i32
    %c0_i32_0 = arith.constant 0 : i32
    %c0_i32_1 = arith.constant 0 : i32
    return %c0_i32, %c0_i32_0 : i32, i32
  }
  func.func @transform_12(%arg0: i32) -> (i32, i32) {
    %c0_i32 = arith.constant 0 : i32
    %c0_i32_0 = arith.constant 0 : i32
    return %arg0, %c0_i32 : i32, i32
  }
}

</mosaic_0001>

<bundles_post_ra>
// kernel: tpu_custom_call.1
= control target key start
LH: loop header
LB: loop body
LE: loop exit
PB: predicated region body
PF: predicated region fallthrough
CT: control target
= control target key end

     0   :  { %17 = vsyncpa [#allocation4], 0  ;;  %s1502_s0 = inlined_call_operand.hbm [shape: f32[16,128], index: 0, kind: input, shape index: {}]   ;;  %s1503_s1 = inlined_call_operand.vmem [shape: f32[1,16], index: 1, kind: input, shape index: {}]   ;;  %s1504_s2 = inlined_call_operand.hbm [shape: bf16[128,128], index: 2, kind: input, shape index: {}]   ;;  %s1505_s3 = inlined_call_operand.vmem [shape: f32[1,128], index: 3, kind: input, shape index: {}]   ;;  %s1506_s4 = inlined_call_operand.hbm [shape: bf16[128,128], index: 4, kind: input, shape index: {}]   ;;  %s1507_s5 = inlined_call_operand.vmem [shape: f32[1,128], index: 5, kind: input, shape index: {}]   ;;  %s1508_s6 = inlined_call_operand.hbm [shape: bf16[128,128], index: 6, kind: input, shape index: {}]   ;;  %s1509_s7 = inlined_call_operand.vmem [shape: f32[1,128], index: 7, kind: input, shape index: {}]   ;;  %s1510_s8 = inlined_call_operand.hbm [shape: bf16[128,128], index: 8, kind: input, shape index: {}]   ;;  %s1511_s9 = inlined_call_operand.vmem [shape: f32[1,128], index: 9, kind: input, shape index: {}]   ;;  %s1512_s10 = inlined_call_operand.hbm [shape: bf16[128,128], index: 10, kind: input, shape index: {}]   ;;  %s1513_s11 = inlined_call_operand.vmem [shape: f32[1,128], index: 11, kind: input, shape index: {}]   ;;  %s1514_s12 = inlined_call_operand.hbm [shape: f32[16,128], index: 12, kind: output, shape index: {}]  }
   0x1   :  { %18 = vsyncpa [#allocation7], 0 }
   0x2   :  { %19 = vsyncpa [#allocation10], 0 }
   0x3   :  { %20 = vsyncpa [#allocation13], 0 }
   0x4   :  { %21 = vsyncpa [#allocation5], 0  ;;  %s1295_s21 = smov [#allocation6]  }
   0x5   :  { %s41_s22 = sshll.u32 %s1295_s21, 4  ;;  %s42_s22 = int_to_ptr.vmem [resolvable:$true] %s41_s22 }
   0x6   :  { %s1153_s23 = scalar_lea.vmem %s42_s22, 1024  ;;  %p1158_p1 = scmp.lt.s32.totalorder %s42_s22, %s42_s22 }
   0x7   :  { %p1154_p0 = scmp.ne.s32.totalorder %s42_s22, %s1153_s23  ;;  %p1159_p2 = scmp.lt.s32.totalorder %s1153_s23, %s1153_s23 }
   0x9   :  { %p1160_p3 = por %p1159_p2, %p1158_p1 }
   0xb   :  { %p1161_p4 = pnand %p1160_p3, %p1154_p0 }
   0xd   :  { %1164 = shalt.err (!%p1161_p4)
}
   0xe   :  { %s1296_s24 = smov 64   ;;  %s1297_s25 = smov 4  }
   0xf   :  { %47 = dma.hbm_to_vmem [thread:$0]  %s1504_s2, 1024, %s42_s22, [#allocation7], %s1296_s24, %s1296_s24, %s1297_s25  }
  0x10   :  { %s1298_s28 = smov [#allocation9]   ;;  %s1299_s30 = smov [#allocation3]  }
  0x11   :  { %s69_s29 = sshll.u32 %s1298_s28, 4  ;;  %s27_s13 = sshll.u32 %s1299_s30, 4  ;;  %s70_s29 = int_to_ptr.vmem [resolvable:$true] %s69_s29  ;;  %s28_s13 = int_to_ptr.vmem [resolvable:$true] %s27_s13 }
  0x12   :  { %s1173_s14 = scalar_lea.vmem %s70_s29, 1024  ;;  %p1178_p6 = scmp.lt.s32.totalorder %s70_s29, %s70_s29 }
  0x13   :  { %p1174_p5 = scmp.ne.s32.totalorder %s70_s29, %s1173_s14  ;;  %p1179_p7 = scmp.lt.s32.totalorder %s1173_s14, %s1173_s14 }
  0x15   :  { %p1180_p8 = por %p1179_p7, %p1178_p6 }
  0x17   :  { %p1181_p9 = pnand %p1180_p8, %p1174_p5 }
  0x19   :  { %1184 = shalt.err (!%p1181_p9)
}
  0x1a   :  { %75 = dma.hbm_to_vmem [thread:$0]  %s1508_s6, 1024, %s70_s29, [#allocation10], %s1296_s24, %s1296_s24, %s1297_s25  }
  0x1b   :  { %s1193_s2 = scalar_lea.vmem %s28_s13, 256  ;;  %p1198_p11 = scmp.lt.s32.totalorder %s28_s13, %s28_s13 }
  0x1c   :  { %p1194_p10 = scmp.ne.s32.totalorder %s28_s13, %s1193_s2  ;;  %p1199_p12 = scmp.lt.s32.totalorder %s1193_s2, %s1193_s2 }
  0x1e   :  { %p1200_p13 = por %p1199_p12, %p1198_p11 }
  0x20   :  { %p1201_p0 = pnand %p1200_p13, %p1194_p10 }
  0x22   :  { %1204 = shalt.err (!%p1201_p0)
}
  0x23   :  { %s1300_s17 = smov 128   ;;  %s1301_s18 = smov 8  }
  0x24   :  { %33 = dma.hbm_to_vmem [thread:$0]  %s1502_s0, 256, %s28_s13, [#allocation4], %s1300_s17, %s1300_s17, %s1301_s18  }
  0x25   :  { %s1302_s21 = smov [#allocation8]   ;;  %s1303_s6 = smov [#allocation11]  }
  0x26   :  { %s55_s22 = sshll.u32 %s1302_s21, 4  ;;  %s83_s23 = sshll.u32 %s1303_s6, 4  ;;  %s56_s22 = int_to_ptr.vmem [resolvable:$true] %s55_s22  ;;  %s84_s23 = int_to_ptr.vmem [resolvable:$true] %s83_s23 }
  0x27   :  { %s1213_s26 = scalar_lea.vmem %s56_s22, 1024  ;;  %p1218_p2 = scmp.lt.s32.totalorder %s56_s22, %s56_s22 }
  0x28   :  { %p1214_p1 = scmp.ne.s32.totalorder %s56_s22, %s1213_s26  ;;  %p1219_p3 = scmp.lt.s32.totalorder %s1213_s26, %s1213_s26 }
  0x2a   :  { %p1220_p4 = por %p1219_p3, %p1218_p2 }
  0x2c   :  { %p1221_p5 = pnand %p1220_p4, %p1214_p1 }
  0x2e   :  { %1224 = shalt.err (!%p1221_p5)
}
  0x2f   :  { %61 = dma.hbm_to_vmem [thread:$0]  %s1506_s4, 1024, %s56_s22, [#allocation7], %s1296_s24, %s1296_s24, %s1297_s25  }
  0x30   :  { %s1233_s0 = scalar_lea.vmem %s84_s23, 1024  ;;  %p1238_p7 = scmp.lt.s32.totalorder %s84_s23, %s84_s23 }
  0x31   :  { %p1234_p6 = scmp.ne.s32.totalorder %s84_s23, %s1233_s0  ;;  %p1239_p8 = scmp.lt.s32.totalorder %s1233_s0, %s1233_s0 }
  0x33   :  { %p1240_p9 = por %p1239_p8, %p1238_p7 }
  0x35   :  { %p1241_p10 = pnand %p1240_p9, %p1234_p6 }
  0x37   :  { %1244 = shalt.err (!%p1241_p10)
}
  0x38   :  { %89 = dma.hbm_to_vmem [thread:$0]  %s1510_s8, 1024, %s84_s23, [#allocation10], %s1296_s24, %s1296_s24, %s1297_s25  }
  0x39   :  { %s1304_s13 = smov [#allocation12]  }
  0x3a   :  { %s97_s14 = sshll.u32 %s1304_s13, 4  ;;  %s98_s14 = int_to_ptr.vmem [resolvable:$true] %s97_s14 }
  0x3b   :  { %s1253_s15 = scalar_lea.vmem %s98_s14, 1024  ;;  %p1258_p12 = scmp.lt.s32.totalorder %s98_s14, %s98_s14 }
  0x3c   :  { %p1254_p11 = scmp.ne.s32.totalorder %s98_s14, %s1253_s15  ;;  %p1259_p13 = scmp.lt.s32.totalorder %s1253_s15, %s1253_s15 }
  0x3e   :  { %p1260_p0 = por %p1259_p13, %p1258_p12 }
  0x40   :  { %p1261_p1 = pnand %p1260_p0, %p1254_p11 }
  0x42   :  { %1264 = shalt.err (!%p1261_p1)
}
  0x43   :  { %103 = dma.hbm_to_vmem [thread:$0]  %s1512_s10, 1024, %s98_s14, [#allocation13], %s1296_s24, %s1296_s24, %s1297_s25  }
  0x44   :  { %1285 = dma.done.wait [#allocation4], 256  }
  0x45   :  { %1286 = vsyncadd [#allocation4], 4294967040 }
  0x46   :  { %1287 = dma.done.wait [#allocation7], 2048  }
  0x47   :  { %1288 = vsyncadd [#allocation7], 4294965248 }
  0x48   :  { %1289 = dma.done.wait [#allocation10], 2048  }
  0x49   :  { %1290 = vsyncadd [#allocation10], 4294965248 }
  0x4a   :  { %1291 = dma.done.wait [#allocation13], 1024  }
  0x4b   :  { %1292 = vsyncadd [#allocation13], 4294966272  ;;  %v1305_v0 = vmov 0.0   ;;  %vm1306_vm0 = vmmov 0   ;;  %v1096_v1 = vld [vmem:[#allocation8 + $0x38] sm:$0xff]   ;;  %v1097_v2 = vld [vmem:[#allocation8 + $0x30] sm:$0xff]  }
  0x4c   :  { %971 = vmatprep.subr.bf16.mxu0 %v1305_v0  ;;  %991 = vmatprep.subr.bf16.mxu1 %v1305_v0  ;;  %v1099_v3 = vld [vmem:[#allocation6 + $0x38] sm:$0xff]   ;;  %v1101_v4 = vld [vmem:[#allocation6 + $0x30] sm:$0xff]   ;;  %v1098_v5 = vld [vmem:[#allocation8 + $0x28] sm:$0xff]   ;;  %vm430_vm1 = vcmask 130048  }
  0x4d   :  { %987 = vmatprep.mubr.msk.bf16.mxu0 %vm1306_vm0, %v1305_v0  ;;  %1007 = vmatprep.mubr.msk.bf16.mxu1 %vm1306_vm0, %v1305_v0  ;;  %v1103_v6 = vld [vmem:[#allocation6 + $0x28] sm:$0xff]   ;;  %v1100_v7 = vld [vmem:[#allocation8 + $0x20] sm:$0xff]   ;;  %v1102_v9 = vld [vmem:[#allocation8 + $0x18] sm:$0xff]  }
  0x4e   :  { %972 = vmatpush3.bf16.msra.mxu0 %v1096_v1  ;;  %992 = vmatpush3.bf16.msra.mxu1 %v1099_v3  ;;  %v1105_v8 = vld [vmem:[#allocation6 + $0x20] sm:$0xff]   ;;  %v1104_v10 = vld [vmem:[#allocation8 + $0x10] sm:$0xff]   ;;  %v1107_v11 = vld [vmem:[#allocation6 + $0x18] sm:$0xff]  }
  0x4f   :  { %973 = vmatprep.subr.bf16.mxu0 %v1305_v0  ;;  %993 = vmatprep.subr.bf16.mxu1 %v1305_v0  ;;  %v1109_v12 = vld [vmem:[#allocation6 + $0x10] sm:$0xff]   ;;  %v1106_v13 = vld [vmem:[#allocation8 + $0x8] sm:$0xff]   ;;  %v1108_v15 = vld [vmem:[#allocation8] sm:$0xff]  }
  0x50   :  { %v1110_v14 = vld [vmem:[#allocation6 + $0x8] sm:$0xff]   ;;  %v1426_v16 = vld [vmem:[#allocation3] sm:$0xff]  ;;  %v1428_v17 = vld [vmem:[#allocation3 + $0x8] sm:$0xff] }
  0x51   :  { %v1111_v18 = vld [vmem:[#allocation6] sm:$0xff]   ;;  %v131_v19 = vpack.c.bf16 %v1428_v17, %v1426_v16  ;;  %v865_v21 = vld [vmem:[%s1507_s5] ss:$0 sm:$0xff]  ;;  %v1113_v58 = vld [vmem:[#allocation9 + $0x38] sm:$0xff]  }
  0x52   :  { %974 = vmatpush3.bf16.msra.mxu0 %v1097_v2  ;;  %994 = vmatpush3.bf16.msra.mxu1 %v1101_v4  ;;  %v876_v32 = vld [vmem:[%s1505_s3] ss:$0 sm:$0xff]  ;;  %v1114_v59 = vld [vmem:[#allocation9 + $0x30] sm:$0xff]   ;;  %v1116_v61 = vld [vmem:[#allocation9 + $0x20] sm:$0xff]  }
  0x53   :  { %975 = vmatprep.subr.bf16.mxu0 %v1305_v0  ;;  %995 = vmatprep.subr.bf16.mxu1 %v1305_v0  ;;  %v885_v39 = vld [vmem:[%s1503_s1] ss:$0 sm:$0xff]  ;;  %v1117_v62 = vld [vmem:[#allocation9 + $0x18] sm:$0xff]   ;;  %v1118_v63 = vld [vmem:[#allocation9 + $0x10] sm:$0xff]  }
  0x54   :  { %v1115_v60 = vld [vmem:[#allocation9 + $0x28] sm:$0xff]  }
  0x56   :  { %976 = vmatpush3.bf16.msra.mxu0 %v1098_v5  ;;  %996 = vmatpush3.bf16.msra.mxu1 %v1103_v6 }
  0x57   :  { %977 = vmatprep.subr.bf16.mxu0 %v1305_v0  ;;  %997 = vmatprep.subr.bf16.mxu1 %v1305_v0 }
  0x5a   :  { %978 = vmatpush3.bf16.msra.mxu0 %v1100_v7  ;;  %998 = vmatpush3.bf16.msra.mxu1 %v1105_v8  ;;  %v1119_v8 = vld [vmem:[#allocation9 + $0x8] sm:$0xff]  }
  0x5b   :  { %979 = vmatprep.subr.bf16.mxu0 %v1305_v0  ;;  %999 = vmatprep.subr.bf16.mxu1 %v1305_v0 }
  0x5e   :  { %980 = vmatpush3.bf16.msra.mxu0 %v1102_v9  ;;  %1000 = vmatpush3.bf16.msra.mxu1 %v1107_v11  ;;  %v1120_v9 = vld [vmem:[#allocation9] sm:$0xff]   ;;  %v1122_v11 = vld [vmem:[#allocation11 + $0x30] sm:$0xff]  }
  0x5f   :  { %981 = vmatprep.subr.bf16.mxu0 %v1305_v0  ;;  %1001 = vmatprep.subr.bf16.mxu1 %v1305_v0 }
  0x62   :  { %982 = vmatpush3.bf16.msra.mxu0 %v1104_v10  ;;  %1002 = vmatpush3.bf16.msra.mxu1 %v1109_v12  ;;  %v1121_v10 = vld [vmem:[#allocation11 + $0x38] sm:$0xff]   ;;  %v1123_v12 = vld [vmem:[#allocation11 + $0x28] sm:$0xff]  }
  0x63   :  { %983 = vmatprep.subr.bf16.mxu0 %v1305_v0  ;;  %1003 = vmatprep.subr.bf16.mxu1 %v1305_v0 }
  0x66   :  { %984 = vmatpush3.bf16.msra.mxu0 %v1106_v13  ;;  %1004 = vmatpush3.bf16.msra.mxu1 %v1110_v14  ;;  %v1124_v13 = vld [vmem:[#allocation11 + $0x20] sm:$0xff]   ;;  %v1125_v14 = vld [vmem:[#allocation11 + $0x18] sm:$0xff]  }
  0x67   :  { %985 = vmatprep.subr.bf16.mxu0 %v1305_v0  ;;  %1005 = vmatprep.subr.bf16.mxu1 %v1305_v0 }
  0x6a   :  { %986 = vmatpush3.bf16.msra.mxu0 %v1108_v15  ;;  %1006 = vmatpush3.bf16.msra.mxu1 %v1111_v18 }
  0x6b   :  { %1023 = vmatprep.subr.bf16.mxu0 %v1305_v0  ;;  %1011 = vmatprep.subr.bf16.mxu1 %v1305_v0 }
  0x6d   :  { %988 = vmatmul.mubr.bf16.vlgmr.msra.gmra.mxu0 %v131_v19  ;;  %1008 = vmatmul.mubr.bf16.vlgmr.msra.gmra.mxu1 %v131_v19 }
  0x6e   :  { %1039 = vmatprep.mubr.msk.bf16.mxu0 %vm1306_vm0, %v1305_v0  ;;  %1013 = vmatprep.mubr.msk.bf16.mxu1 %vm1306_vm0, %v1305_v0 }
  0x6f   :  { %1024 = vmatpush3.bf16.msra.mxu0 %v1113_v58 }
  0x70   :  { %1025 = vmatprep.subr.bf16.mxu0 %v1305_v0 }
  0x73   :  { %1026 = vmatpush3.bf16.msra.mxu0 %v1114_v59 }
  0x74   :  { %1027 = vmatprep.subr.bf16.mxu0 %v1305_v0 }
  0x77   :  { %1028 = vmatpush3.bf16.msra.mxu0 %v1115_v60 }
  0x78   :  { %1029 = vmatprep.subr.bf16.mxu0 %v1305_v0 }
  0x7b   :  { %1030 = vmatpush3.bf16.msra.mxu0 %v1116_v61 }
  0x7c   :  { %1031 = vmatprep.subr.bf16.mxu0 %v1305_v0 }
  0x7f   :  { %1032 = vmatpush3.bf16.msra.mxu0 %v1117_v62 }
  0x80   :  { %1033 = vmatprep.subr.bf16.mxu0 %v1305_v0 }
  0x83   :  { %1034 = vmatpush3.bf16.msra.mxu0 %v1118_v63 }
  0x84   :  { %1035 = vmatprep.subr.bf16.mxu0 %v1305_v0 }
  0x87   :  { %1036 = vmatpush3.bf16.msra.mxu0 %v1119_v8 }
  0x88   :  { %1037 = vmatprep.subr.bf16.mxu0 %v1305_v0 }
  0x8b   :  { %1038 = vmatpush3.bf16.msra.mxu0 %v1120_v9 }
  0x8c   :  { %1063 = vmatprep.subr.bf16.mxu0 %v1305_v0 }
 0x12d   :  { %v237_v20 = vpop.f32.mrf.mxu0  ;;  %v366_v23 = vpop.f32.mrf.mxu1 }
 0x12e   :  { %v238_v25 = vadd.f32 %v865_v21, %v237_v20  ;;  %v367_v33 = vadd.f32 %v876_v32, %v366_v23  ;;  %v1127_v23 = vld [vmem:[#allocation11 + $0x8] sm:$0xff]  }
 0x12f   :  { %v989_v22 = vpop.f32.mrf.mxu0  ;;  %v1009_v27 = vpop.f32.mrf.mxu1 }
 0x130   :  { %v373_v36 = vmul.f32 0.25, %v367_v33  ;;  %v1126_v22 = vld [vmem:[#allocation11 + $0x10] sm:$0xff]   ;;  %v1131_v27 = vld [vmem:[#allocation12 + $0x28] sm:$0xff]  }
 0x131   :  { %v240_v24 = vpop.f32.mrf.mxu0  ;;  %v369_v30 = vpop.f32.mrf.mxu1 }
 0x132   :  { %v241_v26 = vadd.f32 %v865_v21, %v240_v24  ;;  %v370_v34 = vadd.f32 %v876_v32, %v369_v30  ;;  %v1128_v24 = vld [vmem:[#allocation11] sm:$0xff]   ;;  %v888_v30 = vld [vmem:[%s1509_s7] ss:$0 sm:$0xff] }
 0x133   :  { %v990_v28 = vpop.f32.mrf.mxu0  ;;  %v1010_v31 = vpop.f32.mrf.mxu1 }
 0x134   :  { %v920_v29 = vpack.c.bf16 %v241_v26, %v238_v25  ;;  %v374_v37 = vmul.f32 0.25, %v370_v34  ;;  %v1129_v25 = vld [vmem:[#allocation12 + $0x38] sm:$0xff]   ;;  %v1130_v26 = vld [vmem:[#allocation12 + $0x30] sm:$0xff]   ;;  %v1132_v28 = vld [vmem:[#allocation12 + $0x20] sm:$0xff]  }
 0x136   :  { %921 = vst [vmem:[#allocation2] sm:$0xff] %v920_v29   ;;  %v375_v38 = vpack.c.bf16 %v374_v37, %v373_v36  ;;  %v1133_v29 = vld [vmem:[#allocation12 + $0x18] sm:$0xff]  }
 0x13d   :  { %v1112_v35 = vld [vmem:[#allocation2] sm:$0xff]  }
 0x13e   :  { %1012 = vmatpush3.bf16.xpose.msra.mxu1 %v1112_v35 }
 0x13f   :  { %1017 = vmatprep.subr.bf16.mxu1 %v1305_v0 }
 0x145   :  { %1014 = vmatmul.mubr.bf16.vlgmr.msra.gmra.mxu1 %v375_v38 }
 0x146   :  { %1018 = vmatpush3.bf16.msra.mxu1 %v1112_v35  ;;  %1019 = vmatprep.mubr.msk.bf16.mxu1 %vm1306_vm0, %v1305_v0 }
 0x147   :  { %1043 = vmatprep.subr.bf16.mxu1 %v1305_v0 }
 0x205   :  { %v423_v40 = vpop.f32.mrf.mxu1 }
 0x206   :  { %v424_v41 = vadd.f32 %v885_v39, %v423_v40  ;;  %v1134_v40 = vld [vmem:[#allocation12 + $0x10] sm:$0xff]  }
 0x207   :  { %v1015_v42 = vpop.f32.mrf.mxu1 }
 0x208   :  { %v431_v43 = vsel %vm430_vm1, %v424_v41, -inf  ;;  %v1136_v42 = vld [vmem:[#allocation12] sm:$0xff]  }
 0x209   :  { %432 = vmax.xlane.f32.xlu0 %v431_v43  ;;  %v426_v44 = vpop.f32.mrf.mxu1  ;;  %v897_v43 = vld [vmem:[%s1511_s9] ss:$0 sm:$0xff]  ;;  %s1307_s9 = smov [#allocation14]  }
 0x20a   :  { %v427_v45 = vadd.f32 %v885_v39, %v426_v44  ;;  %s850_s22 = sshll.u32 %s1307_s9, 4  ;;  %s851_s22 = int_to_ptr.vmem [resolvable:$true] %s850_s22 }
 0x20b   :  { %v1016_v46 = vpop.f32.mrf.mxu1  ;;  %s1265_s6 = scalar_lea.vmem %s851_s22, 256  ;;  %p1270_p3 = scmp.lt.s32.totalorder %s851_s22, %s851_s22 }
 0x20c   :  { %v434_v47 = vsel %vm430_vm1, %v427_v45, -inf  ;;  %p1266_p2 = scmp.ne.s32.totalorder %s851_s22, %s1265_s6  ;;  %p1271_p4 = scmp.lt.s32.totalorder %s1265_s6, %s1265_s6 }
 0x20d   :  { %435 = vmax.xlane.f32.xlu0 %v434_v47 }
 0x20e   :  { %p1272_p5 = por %p1271_p4, %p1270_p3 }
 0x210   :  { %p1273_p6 = pnand %p1272_p5, %p1266_p2 }
 0x292   :  { %v433_v48 = vpop.xlane.xlu0 %432 }
 0x293   :  { %v437_v49 = vsub.f32 %v424_v41, %v433_v48  ;;  %v1135_v41 = vld [vmem:[#allocation12 + $0x8] sm:$0xff]  }
 0x295   :  { %v439_v50 = vmul.f32 1.442695, %v437_v49 }
 0x296   :  { %v436_v51 = vpop.xlane.xlu0 %435 }
 0x297   :  { %1137 = vpow2.f32 %v439_v50  ;;  %v438_v52 = vsub.f32 %v427_v45, %v436_v51 }
 0x299   :  { %v441_v53 = vmul.f32 1.442695, %v438_v52 }
 0x29b   :  { %1139 = vpow2.f32 %v441_v53 }
 0x2a4   :  { %v1138_v54 = vpop.eup %1137 }
 0x2a5   :  { %v443_v55 = vsel %vm430_vm1, %v1138_v54, 0.0 }
 0x2a6   :  { %444 = vadd.xlane.f32.xlu1 %v443_v55 }
 0x2a8   :  { %v1140_v56 = vpop.eup %1139 }
 0x2a9   :  { %v446_v57 = vsel %vm430_vm1, %v1140_v56, 0.0 }
 0x2aa   :  { %447 = vadd.xlane.f32.xlu1 %v446_v57 }
 0x32f   :  { %v445_v1 = vpop.xlane.xlu1 %444 }
 0x330   :  { %1141 = vrcp.f32 %v445_v1 }
 0x333   :  { %v448_v2 = vpop.xlane.xlu1 %447 }
 0x334   :  { %1143 = vrcp.f32 %v448_v2 }
 0x33d   :  { %v1142_v3 = vpop.eup %1141 }
 0x33e   :  { %v451_v6 = vmul.f32 %v1142_v3, %v1138_v54 }
 0x341   :  { %v1144_v4 = vpop.eup %1143 }
 0x342   :  { %v452_v5 = vmul.f32 %v1144_v4, %v1140_v56 }
 0x344   :  { %v453_v7 = vpack.c.bf16 %v452_v5, %v451_v6 }
 0x346   :  { %1020 = vmatmul.mubr.msk.bf16.vlgmr.msra.gmra.mxu1 %vm430_vm1, %v453_v7 }
 0x347   :  { %1059 = vmatprep.mubr.msk.bf16.mxu1 %vm1306_vm0, %v1305_v0  ;;  %1044 = vmatpush3.bf16.msra.mxu1 %v1121_v10 }
 0x348   :  { %1045 = vmatprep.subr.bf16.mxu1 %v1305_v0 }
 0x34b   :  { %1046 = vmatpush3.bf16.msra.mxu1 %v1122_v11 }
 0x34c   :  { %1047 = vmatprep.subr.bf16.mxu1 %v1305_v0 }
 0x34f   :  { %1048 = vmatpush3.bf16.msra.mxu1 %v1123_v12 }
 0x350   :  { %1049 = vmatprep.subr.bf16.mxu1 %v1305_v0 }
 0x353   :  { %1050 = vmatpush3.bf16.msra.mxu1 %v1124_v13 }
 0x354   :  { %1051 = vmatprep.subr.bf16.mxu1 %v1305_v0 }
 0x357   :  { %1052 = vmatpush3.bf16.msra.mxu1 %v1125_v14 }
 0x358   :  { %1053 = vmatprep.subr.bf16.mxu1 %v1305_v0 }
 0x35b   :  { %1054 = vmatpush3.bf16.msra.mxu1 %v1126_v22 }
 0x35c   :  { %1055 = vmatprep.subr.bf16.mxu1 %v1305_v0 }
 0x35f   :  { %1056 = vmatpush3.bf16.msra.mxu1 %v1127_v23 }
 0x360   :  { %1057 = vmatprep.subr.bf16.mxu1 %v1305_v0 }
 0x363   :  { %1058 = vmatpush3.bf16.msra.mxu1 %v1128_v24 }
 0x406   :  { %v491_v15 = vpop.f32.mrf.mxu1 }
 0x408   :  { %v1021_v18 = vpop.f32.mrf.mxu1 }
 0x40a   :  { %v494_v19 = vpop.f32.mrf.mxu1 }
 0x40b   :  { %v498_v20 = vpack.c.bf16 %v494_v19, %v491_v15 }
 0x40c   :  { %v1022_v21 = vpop.f32.mrf.mxu1 }
 0x40d   :  { %1040 = vmatmul.mubr.bf16.vlgmr.msra.gmra.mxu0 %v498_v20 }
 0x40e   :  { %1079 = vmatprep.mubr.msk.bf16.mxu0 %vm1306_vm0, %v1305_v0  ;;  %1064 = vmatpush3.bf16.msra.mxu0 %v1129_v25 }
 0x40f   :  { %1065 = vmatprep.subr.bf16.mxu0 %v1305_v0 }
 0x412   :  { %1066 = vmatpush3.bf16.msra.mxu0 %v1130_v26 }
 0x413   :  { %1067 = vmatprep.subr.bf16.mxu0 %v1305_v0 }
 0x416   :  { %1068 = vmatpush3.bf16.msra.mxu0 %v1131_v27 }
 0x417   :  { %1069 = vmatprep.subr.bf16.mxu0 %v1305_v0 }
 0x41a   :  { %1070 = vmatpush3.bf16.msra.mxu0 %v1132_v28 }
 0x41b   :  { %1071 = vmatprep.subr.bf16.mxu0 %v1305_v0 }
 0x41e   :  { %1072 = vmatpush3.bf16.msra.mxu0 %v1133_v29 }
 0x41f   :  { %1073 = vmatprep.subr.bf16.mxu0 %v1305_v0 }
 0x422   :  { %1074 = vmatpush3.bf16.msra.mxu0 %v1134_v40 }
 0x423   :  { %1075 = vmatprep.subr.bf16.mxu0 %v1305_v0 }
 0x426   :  { %1076 = vmatpush3.bf16.msra.mxu0 %v1135_v41 }
 0x427   :  { %1077 = vmatprep.subr.bf16.mxu0 %v1305_v0  ;;  %v906_v0 = vld [vmem:[%s1513_s11] ss:$0 sm:$0xff] }
 0x42a   :  { %1078 = vmatpush3.bf16.msra.mxu0 %v1136_v42 }
 0x4cd   :  { %v604_v31 = vpop.f32.mrf.mxu0 }
 0x4ce   :  { %v605_v33 = vadd.f32 %v888_v30, %v604_v31 }
 0x4cf   :  { %v1041_v32 = vpop.f32.mrf.mxu0 }
 0x4d0   :  { %v611_v37 = vadd.f32 %v605_v33, %v1426_v16 }
 0x4d1   :  { %v607_v34 = vpop.f32.mrf.mxu0 }
 0x4d2   :  { %v608_v35 = vadd.f32 %v888_v30, %v607_v34 }
 0x4d3   :  { %v1042_v36 = vpop.f32.mrf.mxu0 }
 0x4d4   :  { %v612_v38 = vadd.f32 %v608_v35, %v1428_v17 }
 0x4d6   :  { %v613_v39 = vpack.c.bf16 %v612_v38, %v611_v37 }
 0x4d8   :  { %1060 = vmatmul.mubr.bf16.vlgmr.msra.gmra.mxu1 %v613_v39 }
 0x598   :  { %v719_v44 = vpop.f32.mrf.mxu1 }
 0x599   :  { %v720_v45 = vadd.f32 %v897_v43, %v719_v44 }
 0x59a   :  { %v1061_v16 = vpop.f32.mrf.mxu1 }
 0x59b   :  { %v726_v48 = vmax.f32 %v720_v45, 0.0 }
 0x59c   :  { %v722_v17 = vpop.f32.mrf.mxu1 }
 0x59d   :  { %v723_v46 = vadd.f32 %v897_v43, %v722_v17 }
 0x59e   :  { %v1062_v47 = vpop.f32.mrf.mxu1 }
 0x59f   :  { %v727_v49 = vmax.f32 %v723_v46, 0.0 }
 0x5a1   :  { %v728_v50 = vpack.c.bf16 %v727_v49, %v726_v48 }
 0x5a3   :  { %1080 = vmatmul.mubr.bf16.vlgmr.msra.gmra.mxu0 %v728_v50 }
 0x663   :  { %v834_v51 = vpop.f32.mrf.mxu0 }
 0x664   :  { %v835_v52 = vadd.f32 %v906_v0, %v834_v51 }
 0x665   :  { %v1081_v53 = vpop.f32.mrf.mxu0 }
 0x666   :  { %v841_v54 = vadd.f32 %v835_v52, %v611_v37 }
 0x667   :  { %v837_v55 = vpop.f32.mrf.mxu0 }
 0x668   :  { %843 = vst [vmem:[#allocation14] sm:$0xff] %v841_v54  ;;  %v838_v56 = vadd.f32 %v906_v0, %v837_v55 }
 0x669   :  { %v1082_v57 = vpop.f32.mrf.mxu0 }
 0x66a   :  { %v842_v58 = vadd.f32 %v838_v56, %v612_v38 }
 0x66c   :  { %844 = vst [vmem:[#allocation14 + $0x8] sm:$0xff] %v842_v58 }
 0x66d   :  { %1276 = shalt.err (!%p1273_p6)
}
 0x66e   :  { %856 = dma.vmem_to_hbm [thread:$0]  %s851_s22, 256, %s1514_s12, [#allocation5], %s1300_s17, %s1300_s17, %s1301_s18  }
 0x66f   :  { %1293 = dma.done.wait [#allocation5], 256  }
 0x670   :  { %1294 = vsyncadd [#allocation5], 4294967040 }
 0x671   :  { %860 = vsyncpa [#allocation4], 1 }
 0x672   :  { %861 = vsyncpa [#allocation7], 1 }
 0x673   :  { %862 = vsyncpa [#allocation10], 1 }
 0x674   :  { %863 = vsyncpa [#allocation13], 1 }
 0x675   :  { %864 = vsyncpa [#allocation5], 1 }

</bundles_post_ra>
